<compile_context>
chip_gen: v7x
topology: tpu7x:2x2x1
jax: 0.10.0
libtpu: 0.0.40
codegen_flags: <defaults>
</compile_context>

<pallas_src>
import functools

import jax
import jax.numpy as jnp
from jax import lax
from jax.experimental import pallas as pl
from jax.experimental.pallas import tpu as pltpu


def gbms_rnn_kernel(bw_ref, x_ref, o_ref, *, tk):
    # bw_ref: (1, 1) scalar bandwidth in SMEM
    # x_ref / o_ref: (block_b, N, D) VMEM tiles (block_b batch elements per grid step)
    bt, n, d = x_ref.shape
    num_k = n // tk

    bw = bw_ref[0, 0]
    inv_bw2 = 1.0 / (bw * bw)                                   # hoisted scalar

    xq = x_ref[...].astype(jnp.float32)                         # (Bt, N, D) queries
    ones_tile = jnp.ones((bt, tk, 1), jnp.float32)              # hoisted out of loop

    def tile_step(kt, y_acc):
        start = pl.multiple_of(kt * tk, tk)
        xk = x_ref[:, pl.ds(start, tk), :].astype(jnp.float32)  # (Bt, Tk, D) keys

        # Gram tile: contraction over D directly (no x.T materialization).  Kept in
        # f32 because the exponent scales it by 1/bw^2.
        s = jnp.einsum("bqd,bkd->bqk", xq, xk,
                       preferred_element_type=jnp.float32)      # (Bt, N, Tk) on MXU
        w = jnp.exp((s - 1.0) * inv_bw2)                        # EUP exp, values in (0, 1]

        # Fuse the row-sum into the second matmul: last column of x_aug is ones, so
        # the last column of y_aug accumulates W.sum(-1).
        xk_aug = jnp.concatenate([xk, ones_tile], axis=-1).astype(jnp.bfloat16)
        return y_acc + jnp.einsum("bqk,bkd->bqd",
                                  w.astype(jnp.bfloat16), xk_aug,
                                  preferred_element_type=jnp.float32)

    y0 = jnp.zeros((bt, n, d + 1), jnp.float32)
    if num_k == 1:
        y_aug = tile_step(jnp.int32(0), y0)
    else:
        y_aug = lax.fori_loop(0, num_k, tile_step, y0, unroll=num_k <= 4)

    y = y_aug[..., :d]                                          # (Bt, N, D) = W @ X
    rowsum = y_aug[..., d:d + 1]                                # (Bt, N, 1) = W.sum(-1) >= 1
    # D_inv @ (W @ X): per-row scale; approx reciprocal error cancels under the L2 norm.
    y = y * pl.reciprocal(rowsum, approx=True)

    # Normalize(): project each updated point back to the unit sphere (row-wise L2).
    sumsq = jnp.sum(y * y, axis=-1, keepdims=True)
    y = y * lax.rsqrt(jnp.maximum(sumsq, 1e-24))                # clamp avoids NaN on zero rows

    o_ref[...] = y.astype(o_ref.dtype)


def gbms_rnn(x, bandwidth=0.1, *, vmem_budget_bytes=20 * 1024 * 1024):
    """x: (B, N, D) float32.  Returns (B, N, D) float32."""
    B, N, D = x.shape

    # Key-tile size: never materialize more than an (N, tk) slab of the affinity.
    if N <= 512:
        tk = N
    else:
        tk = N  # fallback: monolithic (only if N has no nice divisor)
        for cand in (512, 256, 128):
            if N % cand == 0:
                tk = cand
                break

    # Per-batch-element live VMEM (bytes): x(f32) + y_aug accumulator(f32)
    # + s/w tiles (f32 + bf16) + bf16 augmented key tile.
    per_b = (4 * N * D) + (4 * N * (D + 1)) + (N * tk * (4 + 4 + 2)) + (2 * tk * (D + 1))
    block_b = max(1, min(B, vmem_budget_bytes // max(per_b, 1)))
    while B % block_b:               # keep the grid exact (no ragged last block)
        block_b -= 1

    # Scoped VMEM: internal live values + double-buffered in/out blocks + slack.
    est = block_b * per_b + 4 * (4 * block_b * N * D) + (4 << 20)
    vmem_limit = int(min(64 * 1024 * 1024, max(32 * 1024 * 1024, est)))

    bw = jnp.asarray(bandwidth, dtype=jnp.float32).reshape(1, 1)
    kernel = functools.partial(gbms_rnn_kernel, tk=tk)

    return pl.pallas_call(
        kernel,
        out_shape=jax.ShapeDtypeStruct((B, N, D), x.dtype),
        grid=(B // block_b,),
        in_specs=[
            pl.BlockSpec(memory_space=pltpu.MemorySpace.SMEM),        # bandwidth scalar
            pl.BlockSpec((block_b, N, D), lambda b: (b, 0, 0)),       # X block per step
        ],
        out_specs=pl.BlockSpec((block_b, N, D), lambda b: (b, 0, 0)),
        compiler_params=pltpu.CompilerParams(
            dimension_semantics=("parallel",),
            vmem_limit_bytes=vmem_limit,
        ),
    )(bw, x)


if __name__ == "__main__":
    # Deterministic parameter init (module __init__): bandwidth = 0.1 (scalar Parameter).
    bandwidth = 0.1

    # Small example input consistent with the forward: (batch, n_points, feature_dim).
    B, N, D = 2, 64, 32
    key = jax.random.PRNGKey(0)
    x = jax.random.normal(key, (B, N, D), dtype=jnp.float32)
    # GBMS with the normalize branch operates on the unit sphere; normalize inputs so
    # that (X X^T - 1)/bw^2 <= 0 and exp() stays in range (as the module assumes).
    x = x / jnp.linalg.norm(x, axis=-1, keepdims=True)

    out = gbms_rnn(x, bandwidth=bandwidth)
    jax.block_until_ready(out)

    assert out.shape == (B, N, D) and out.dtype == jnp.float32
    assert bool(jnp.all(jnp.isfinite(out)))
    print("KERNEL_OK")
</pallas_src>

<mosaic_0001>
module attributes {stable_mosaic.version = 11 : i64} {
  func.func @gbms_rnn_kernel(%arg0: i32, %arg1: memref<1x1xf32, #tpu.memory_space<smem>>, %arg2: memref<2x64x32xf32, #tpu.memory_space<vmem>>, %arg3: memref<2x64x32xf32, #tpu.memory_space<vmem>>) attributes {dimension_semantics = [#tpu.dimension_semantics<parallel>], iteration_bounds = array<i64: 1>, scalar_prefetch = 0 : i64, scratch_operands = 0 : i64, tpu.core_type = #tpu.core_type<tc>, window_params = [{transform_indices = @transform_0, window_bounds = array<i64: 1, 1>}, {transform_indices = @transform_1, window_bounds = array<i64: 2, 64, 32>}, {transform_indices = @transform_2, window_bounds = array<i64: 2, 64, 32>}]} {
    %c0 = arith.constant 0 : index
    %c0_0 = arith.constant 0 : index
    %0 = memref.load %arg1[%c0, %c0_0] : memref<1x1xf32, #tpu.memory_space<smem>>
    %1 = arith.mulf %0, %0 : f32
    %cst = arith.constant 1.000000e+00 : f32
    %2 = arith.divf %cst, %1 : f32
    %c0_1 = arith.constant 0 : index
    %c0_2 = arith.constant 0 : index
    %c0_3 = arith.constant 0 : index
    %3 = vector.load %arg2[%c0_1, %c0_2, %c0_3] : memref<2x64x32xf32, #tpu.memory_space<vmem>>, vector<2x64x32xf32>
    %cst_4 = arith.constant 1.000000e+00 : f32
    %4 = vector.broadcast %cst_4 : f32 to vector<2x64x1xf32>
    %cst_5 = arith.constant 0.000000e+00 : f32
    %5 = vector.broadcast %cst_5 : f32 to vector<2x64x33xf32>
    %c0_i32 = arith.constant 0 : i32
    %c64_i32 = arith.constant 64 : i32
    %6 = arith.muli %c0_i32, %c64_i32 : i32
    %7 = tpu.assume_multiple %6, 64 : i32
    %c0_6 = arith.constant 0 : index
    %8 = arith.index_cast %7 : i32 to index
    %c0_7 = arith.constant 0 : index
    %9 = vector.load %arg2[%c0_6, %8, %c0_7] : memref<2x64x32xf32, #tpu.memory_space<vmem>>, vector<2x64x32xf32>
    "tpu.trace_start"() <{level = 10 : i32, message = "bqd,bkd->bqk"}> : () -> ()
    %cst_8 = arith.constant dense<0.000000e+00> : vector<2x64x64xf32>
    %10 = tpu.matmul %3, %9, %cst_8 {dimension_numbers = #tpu.dot_dimension_numbers<[2], [2], [1], [1], [0, 0, 0, 1, 1, 1], [0], [0]>} : vector<2x64x32xf32>, vector<2x64x32xf32>, vector<2x64x64xf32> -> vector<2x64x64xf32>
    "tpu.trace_stop"() : () -> ()
    %cst_9 = arith.constant 1.000000e+00 : f32
    %11 = vector.broadcast %cst_9 : f32 to vector<2x64x64xf32>
    %12 = arith.subf %10, %11 : vector<2x64x64xf32>
    %13 = vector.broadcast %2 : f32 to vector<2x64x64xf32>
    %14 = arith.mulf %12, %13 : vector<2x64x64xf32>
    %15 = math.exp %14 : vector<2x64x64xf32>
    %16 = tpu.concatenate %9, %4 in 2 : vector<2x64x32xf32>, vector<2x64x1xf32> -> vector<2x64x33xf32>
    %17 = arith.truncf %16 : vector<2x64x33xf32> to vector<2x64x33xbf16>
    %18 = arith.truncf %15 : vector<2x64x64xf32> to vector<2x64x64xbf16>
    "tpu.trace_start"() <{level = 10 : i32, message = "bqk,bkd->bqd"}> : () -> ()
    %cst_10 = arith.constant dense<0.000000e+00> : vector<2x64x33xf32>
    %19 = tpu.matmul %18, %17, %cst_10 {dimension_numbers = #tpu.dot_dimension_numbers<[2], [1], [1], [2], [0, 0, 0, 1, 1, 2], [0], [0]>} : vector<2x64x64xbf16>, vector<2x64x33xbf16>, vector<2x64x33xf32> -> vector<2x64x33xf32>
    "tpu.trace_stop"() : () -> ()
    %20 = arith.addf %5, %19 : vector<2x64x33xf32>
    %21 = vector.extract_strided_slice %20 {offsets = [0, 0, 0], sizes = [2, 64, 32], strides = [1, 1, 1]} : vector<2x64x33xf32> to vector<2x64x32xf32>
    %22 = vector.extract_strided_slice %20 {offsets = [0, 0, 32], sizes = [2, 64, 1], strides = [1, 1, 1]} : vector<2x64x33xf32> to vector<2x64x1xf32>
    %23 = tpu.reciprocal %22 {approx = true} : vector<2x64x1xf32> -> vector<2x64x1xf32>
    %24 = vector.broadcast %23 : vector<2x64x1xf32> to vector<2x64x32xf32>
    %25 = arith.mulf %21, %24 : vector<2x64x32xf32>
    %26 = arith.mulf %25, %25 : vector<2x64x32xf32>
    %cst_11 = arith.constant dense<0.000000e+00> : vector<2x64xf32>
    %27 = vector.multi_reduction <add>, %26, %cst_11 [2] : vector<2x64x32xf32> to vector<2x64xf32>
    %28 = vector.shape_cast %27 : vector<2x64xf32> to vector<2x64x1xf32>
    %cst_12 = arith.constant 1.000000e-24 : f32
    %29 = vector.broadcast %cst_12 : f32 to vector<2x64x1xf32>
    %30 = arith.maximumf %28, %29 : vector<2x64x1xf32>
    %31 = math.rsqrt %30 : vector<2x64x1xf32>
    %32 = vector.broadcast %31 : vector<2x64x1xf32> to vector<2x64x32xf32>
    %33 = arith.mulf %25, %32 : vector<2x64x32xf32>
    %c0_13 = arith.constant 0 : index
    %c0_14 = arith.constant 0 : index
    %c0_15 = arith.constant 0 : index
    %34 = vector.load %arg3[%c0_13, %c0_14, %c0_15] : memref<2x64x32xf32, #tpu.memory_space<vmem>>, vector<2x64x32xf32>
    tpu.vector_store %arg3[%c0_13, %c0_14, %c0_15], %33 {strides = array<i32>} : memref<2x64x32xf32, #tpu.memory_space<vmem>>, vector<2x64x32xf32>,
    return
  }
  func.func @transform_0(%arg0: i32) -> (i32, i32) {
    %c0_i32 = arith.constant 0 : i32
    %c0_i32_0 = arith.constant 0 : i32
    %c0_i32_1 = arith.constant 0 : i32
    return %c0_i32, %c0_i32_0 : i32, i32
  }
  func.func @transform_1(%arg0: i32) -> (i32, i32, i32) {
    %c0_i32 = arith.constant 0 : i32
    %c0_i32_0 = arith.constant 0 : i32
    %c0_i32_1 = arith.constant 0 : i32
    return %arg0, %c0_i32, %c0_i32_0 : i32, i32, i32
  }
  func.func @transform_2(%arg0: i32) -> (i32, i32, i32) {
    %c0_i32 = arith.constant 0 : i32
    %c0_i32_0 = arith.constant 0 : i32
    %c0_i32_1 = arith.constant 0 : i32
    return %arg0, %c0_i32, %c0_i32_0 : i32, i32, i32
  }
}

</mosaic_0001>

<bundles_post_ra>
// kernel: tpu_custom_call.1
= control target key start
LH: loop header
LB: loop body
LE: loop exit
PB: predicated region body
PF: predicated region fallthrough
CT: control target
= control target key end

     0   :  { %vm50_vm0 = vcmask 261120   ;;  %vm454_vm2 = vcmask 523264   ;;  %s1604_s1 = inlined_call_operand.vmem [shape: f32[2,64,32], index: 1, kind: input, shape index: {}]   ;;  %s1605_s0 = inlined_call_operand.<no memory space> [shape: f32[1,1], index: 0, kind: input, shape index: {}]   ;;  %s1606_s2 = inlined_call_operand.vmem [shape: f32[2,64,32], index: 2, kind: output, shape index: {}]  }
   0x1   :  { %v34_v0 = vld [vmem:[%s1604_s1] sm:$0xff]  ;;  %v35_v1 = vld [vmem:[%s1604_s1 + $0x8] sm:$0xff]  ;;  %vm1220_vm1 = vmpackc.low %vm50_vm0, %vm50_vm0  ;;  %s14_s15 = smul.f32 %s1605_s0, %s1605_s0 }
   0x2   :  { %v1045_v3 = vpack.c.bf16 %v35_v1, %v34_v0  ;;  %v42_v4 = vld [vmem:[%s1604_s1 + $0x40] sm:$0xff]  ;;  %v43_v5 = vld [vmem:[%s1604_s1 + $0x48] sm:$0xff]  ;;  %v1237_v6 = vld [vmem:[%s1604_s1 + $0x10] sm:$0xff]  ;;  %973 = vmatprep.mubr.msk.f32.mxu0 %vm50_vm0, %v34_v0  ;;  %v422_v27 = vsel %vm50_vm0, %v34_v0, 1.0  ;;  %v423_v28 = vsel %vm50_vm0, %v35_v1, 1.0 }
   0x3   :  { %v1069_v7 = vpack.c.bf16 %v43_v5, %v42_v4  ;;  %v1243_v8 = vld [vmem:[%s1604_s1 + $0x18] sm:$0xff]  ;;  %v1248_v9 = vld [vmem:[%s1604_s1 + $0x50] sm:$0xff]  ;;  %1001 = vmatprep.mubr.msk.f32.mxu1 %vm50_vm0, %v42_v4  ;;  %v15_v11 = vstv %s14_s15  ;;  %v38_v14 = vld [vmem:[%s1604_s1 + $0x20] sm:$0xff]  ;;  %v430_v29 = vsel %vm50_vm0, %v42_v4, 1.0  ;;  %v431_v30 = vsel %vm50_vm0, %v43_v5, 1.0 }
   0x4   :  { %v1253_v10 = vld [vmem:[%s1604_s1 + $0x58] sm:$0xff]  ;;  %1047 = vmatprep.subr.msk.bf16.mxu0 %vm1220_vm1, %v1045_v3  ;;  %v1051_v12 = vpack.c.bf16 %v1243_v8, %v1237_v6  ;;  %1098 = vrcp.f32 %v15_v11  ;;  %v39_v15 = vld [vmem:[%s1604_s1 + $0x28] sm:$0xff]  ;;  %v46_v16 = vld [vmem:[%s1604_s1 + $0x60] sm:$0xff]  ;;  %v438_v31 = vpack.c.bf16 %v423_v28, %v422_v27  ;;  %v442_v32 = vpack.c.bf16 %v431_v30, %v430_v29 }
   0x5   :  { %v1075_v13 = vpack.c.bf16 %v1253_v10, %v1248_v9  ;;  %1071 = vmatprep.subr.msk.bf16.mxu1 %vm1220_vm1, %v1069_v7  ;;  %1050 = vmatpush3.bf16.xpose.msk.msra.mxu0 %vm1220_vm1, %v1045_v3  ;;  %v47_v17 = vld [vmem:[%s1604_s1 + $0x68] sm:$0xff]  ;;  %v1057_v18 = vpack.c.bf16 %v39_v15, %v38_v14  ;;  %v40_v21 = vld [vmem:[%s1604_s1 + $0x30] sm:$0xff]  ;;  %v41_v22 = vld [vmem:[%s1604_s1 + $0x38] sm:$0xff]  ;;  %v424_v33 = vsel %vm50_vm0, %v1237_v6, 1.0  ;;  %v425_v34 = vsel %vm50_vm0, %v1243_v8, 1.0 }
   0x6   :  { %1074 = vmatpush3.bf16.xpose.msk.msra.mxu1 %vm1220_vm1, %v1069_v7  ;;  %1053 = vmatprep.subr.msk.bf16.mxu0 %vm1220_vm1, %v1051_v12  ;;  %v1081_v19 = vpack.c.bf16 %v47_v17, %v46_v16  ;;  %v48_v23 = vld [vmem:[%s1604_s1 + $0x70] sm:$0xff]  ;;  %v49_v24 = vld [vmem:[%s1604_s1 + $0x78] sm:$0xff]  ;;  %v1063_v25 = vpack.c.bf16 %v41_v22, %v40_v21  ;;  %v432_v35 = vsel %vm50_vm0, %v1248_v9, 1.0  ;;  %v433_v36 = vsel %vm50_vm0, %v1253_v10, 1.0 }
   0x7   :  { %1077 = vmatprep.subr.msk.bf16.mxu1 %vm1220_vm1, %v1075_v13  ;;  %v1087_v26 = vpack.c.bf16 %v49_v24, %v48_v23  ;;  %v439_v37 = vpack.c.bf16 %v425_v34, %v424_v33  ;;  %v443_v38 = vpack.c.bf16 %v433_v36, %v432_v35  ;;  %v426_v39 = vsel %vm50_vm0, %v38_v14, 1.0 }
   0x8   :  { %v427_v40 = vsel %vm50_vm0, %v39_v15, 1.0  ;;  %v434_v41 = vsel %vm50_vm0, %v46_v16, 1.0  ;;  %v435_v42 = vsel %vm50_vm0, %v47_v17, 1.0  ;;  %v428_v45 = vsel %vm50_vm0, %v40_v21, 1.0 }
   0x9   :  { %v440_v43 = vpack.c.bf16 %v427_v40, %v426_v39  ;;  %v444_v44 = vpack.c.bf16 %v435_v42, %v434_v41  ;;  %v429_v46 = vsel %vm50_vm0, %v41_v22, 1.0  ;;  %v436_v47 = vsel %vm50_vm0, %v48_v23, 1.0 }
   0xa   :  { %v437_v48 = vsel %vm50_vm0, %v49_v24, 1.0  ;;  %v441_v49 = vpack.c.bf16 %v429_v46, %v428_v45 }
   0xb   :  { %v445_v50 = vpack.c.bf16 %v437_v48, %v436_v47 }
   0xd   :  { %1056 = vmatpush3.bf16.xpose.msk.msra.mxu0 %vm1220_vm1, %v1051_v12 }
   0xe   :  { %v1099_v20 = vpop.eup %1098  ;;  %1080 = vmatpush3.bf16.xpose.msk.msra.mxu1 %vm1220_vm1, %v1075_v13  ;;  %1059 = vmatprep.subr.msk.bf16.mxu0 %vm1220_vm1, %v1057_v18 }
   0xf   :  { %1083 = vmatprep.subr.msk.bf16.mxu1 %vm1220_vm1, %v1081_v19  ;;  %1093 = vpush %v1099_v20 }
  0x15   :  { %1062 = vmatpush3.bf16.xpose.msk.msra.mxu0 %vm1220_vm1, %v1057_v18 }
  0x16   :  { %1086 = vmatpush3.bf16.xpose.msk.msra.mxu1 %vm1220_vm1, %v1081_v19  ;;  %1065 = vmatprep.subr.msk.bf16.mxu0 %vm1220_vm1, %v1063_v25 }
  0x17   :  { %1089 = vmatprep.subr.msk.bf16.mxu1 %vm1220_vm1, %v1087_v26 }
  0x1d   :  { %1068 = vmatpush3.bf16.xpose.msk.msra.mxu0 %vm1220_vm1, %v1063_v25 }
  0x1e   :  { %1092 = vmatpush3.bf16.xpose.msk.msra.mxu1 %vm1220_vm1, %v1087_v26  ;;  %1013 = vmatprep.subr.bf16.mxu0 %v438_v31 }
  0x1f   :  { %1029 = vmatprep.subr.bf16.mxu1 %v442_v32 }
  0x24   :  { %974 = vmatmul.mubr.msk.f32.vlgmr.msra.gmra.mrb[0].mxu0 %vm50_vm0, %v35_v1 }
  0x25   :  { %1002 = vmatmul.mubr.msk.f32.vlgmr.msra.gmra.mrb[0].mxu1 %vm50_vm0, %v43_v5  ;;  %976 = vmatprep.mubr.msk.f32.mxu0 %vm50_vm0, %v1237_v6 }
  0x26   :  { %1004 = vmatprep.mubr.msk.f32.mxu1 %vm50_vm0, %v1248_v9  ;;  %1014 = vmatpush3.bf16.msra.mxu0 %v438_v31 }
  0x27   :  { %1030 = vmatpush3.bf16.msra.mxu1 %v442_v32  ;;  %1015 = vmatprep.subr.bf16.mxu0 %v439_v37 }
  0x28   :  { %977 = vmatmul.mubr.msk.f32.gmra.mrb[2].mxu0 %vm50_vm0, %v1243_v8  ;;  %1031 = vmatprep.subr.bf16.mxu1 %v443_v38 }
  0x29   :  { %1005 = vmatmul.mubr.msk.f32.gmra.mrb[2].mxu1 %vm50_vm0, %v1253_v10  ;;  %979 = vmatprep.mubr.msk.f32.mxu0 %vm50_vm0, %v38_v14 }
  0x2a   :  { %1007 = vmatprep.mubr.msk.f32.mxu1 %vm50_vm0, %v46_v16  ;;  %1016 = vmatpush3.bf16.msra.mxu0 %v439_v37 }
  0x2b   :  { %1032 = vmatpush3.bf16.msra.mxu1 %v443_v38  ;;  %1017 = vmatprep.subr.bf16.mxu0 %v440_v43 }
  0x2c   :  { %980 = vmatmul.mubr.msk.f32.gmra.mrb[4].mxu0 %vm50_vm0, %v39_v15  ;;  %1033 = vmatprep.subr.bf16.mxu1 %v444_v44 }
  0x2d   :  { %1008 = vmatmul.mubr.msk.f32.gmra.mrb[4].mxu1 %vm50_vm0, %v47_v17  ;;  %982 = vmatprep.mubr.msk.f32.mxu0 %vm50_vm0, %v40_v21 }
  0x2e   :  { %1010 = vmatprep.mubr.msk.f32.mxu1 %vm50_vm0, %v48_v23  ;;  %1018 = vmatpush3.bf16.msra.mxu0 %v440_v43 }
  0x2f   :  { %1034 = vmatpush3.bf16.msra.mxu1 %v444_v44  ;;  %1019 = vmatprep.subr.bf16.mxu0 %v441_v49 }
  0x30   :  { %983 = vmatmul.mubr.msk.f32.gmra.mrb[6].mxu0 %vm50_vm0, %v41_v22  ;;  %1035 = vmatprep.subr.bf16.mxu1 %v445_v50 }
  0x31   :  { %1011 = vmatmul.mubr.msk.f32.gmra.mrb[6].mxu1 %vm50_vm0, %v49_v24 }
  0x32   :  { %1020 = vmatpush3.bf16.msra.mxu0 %v441_v49 }
  0x33   :  { %1036 = vmatpush3.bf16.msra.mxu1 %v445_v50 }
  0x40   :  { %s1094_s1 = spop %1093 }
  0x41   :  { %v1354_v52 = vstv %s1094_s1 }
  0xf7   :  { %v975_v51 = vpop.f32.mrb[0].mxu0 }
  0xf8   :  { %v886_v53 = vadd.f32 -1.0, %v975_v51  ;;  %v1003_v54 = vpop.f32.mrb[0].mxu1  ;;  %v165_v55 = vpop.f32.mrb[1].mxu0 }
  0xf9   :  { %v885_v56 = vadd.f32 -1.0, %v165_v55  ;;  %v318_v57 = vpop.f32.mrb[1].mxu1  ;;  %v894_v3 = vadd.f32 -1.0, %v1003_v54 }
  0xfa   :  { %v893_v58 = vadd.f32 -1.0, %v318_v57  ;;  %v375_v59 = vmul.f32 %v886_v53, %v1354_v52 }
  0xfb   :  { %v374_v60 = vmul.f32 %v885_v56, %v1354_v52  ;;  %v978_v61 = vpop.f32.mrb[2].mxu0  ;;  %v383_v26 = vmul.f32 %v894_v3, %v1354_v52 }
  0xfc   :  { %v382_v62 = vmul.f32 %v893_v58, %v1354_v52  ;;  %v888_v63 = vadd.f32 -1.0, %v978_v61  ;;  %v1006_v0 = vpop.f32.mrb[2].mxu1  ;;  %v175_v1 = vpop.f32.mrb[3].mxu0  ;;  %v392_v2 = vmul.f32 1.442695, %v375_v59 }
  0xfd   :  { %v390_v4 = vmul.f32 1.442695, %v374_v60  ;;  %v896_v5 = vadd.f32 -1.0, %v1006_v0  ;;  %v887_v6 = vadd.f32 -1.0, %v175_v1  ;;  %v328_v7 = vpop.f32.mrb[3].mxu1 }
  0xfe   :  { %v406_v8 = vmul.f32 1.442695, %v382_v62  ;;  %v377_v9 = vmul.f32 %v888_v63, %v1354_v52  ;;  %v895_v10 = vadd.f32 -1.0, %v328_v7  ;;  %1100 = vpow2.f32 %v392_v2 }
  0xff   :  { %1102 = vpow2.f32 %v390_v4  ;;  %v385_v11 = vmul.f32 %v896_v5, %v1354_v52  ;;  %v376_v12 = vmul.f32 %v887_v6, %v1354_v52  ;;  %v981_v13 = vpop.f32.mrb[4].mxu0  ;;  %v408_v44 = vmul.f32 1.442695, %v383_v26 }
 0x100   :  { %1104 = vpow2.f32 %v406_v8  ;;  %v396_v14 = vmul.f32 1.442695, %v377_v9  ;;  %v384_v15 = vmul.f32 %v895_v10, %v1354_v52  ;;  %v890_v16 = vadd.f32 -1.0, %v981_v13  ;;  %v1009_v17 = vpop.f32.mrb[4].mxu1  ;;  %v185_v18 = vpop.f32.mrb[5].mxu0 }
 0x101   :  { %v412_v19 = vmul.f32 1.442695, %v385_v11  ;;  %v394_v20 = vmul.f32 1.442695, %v376_v12  ;;  %v898_v21 = vadd.f32 -1.0, %v1009_v17  ;;  %v889_v22 = vadd.f32 -1.0, %v185_v18 }
 0x102   :  { %1106 = vpow2.f32 %v396_v14  ;;  %v410_v23 = vmul.f32 1.442695, %v384_v15  ;;  %v379_v24 = vmul.f32 %v890_v16, %v1354_v52  ;;  %v338_v25 = vpop.f32.mrb[5].mxu1  ;;  %v1196_v12 = vmov 32  }
 0x103   :  { %1108 = vpow2.f32 %v412_v19  ;;  %v387_v27 = vmul.f32 %v898_v21, %v1354_v52  ;;  %v378_v28 = vmul.f32 %v889_v22, %v1354_v52  ;;  %v897_v29 = vadd.f32 -1.0, %v338_v25  ;;  %v984_v30 = vpop.f32.mrb[6].mxu0  ;;  %1097 = vset.pattern.permute.xlu0 %v1196_v12  ;;  %1096 = vset.pattern.permute.xlu1 %v1196_v12 }
 0x104   :  { %1110 = vpow2.f32 %v394_v20  ;;  %v400_v31 = vmul.f32 1.442695, %v379_v24  ;;  %v892_v32 = vadd.f32 -1.0, %v984_v30  ;;  %v1012_v33 = vpop.f32.mrb[6].mxu1  ;;  %v195_v34 = vpop.f32.mrb[7].mxu0 }
 0x105   :  { %1112 = vpow2.f32 %v410_v23  ;;  %v416_v35 = vmul.f32 1.442695, %v387_v27  ;;  %v398_v36 = vmul.f32 1.442695, %v378_v28  ;;  %v386_v37 = vmul.f32 %v897_v29, %v1354_v52  ;;  %v348_v38 = vpop.f32.mrb[7].mxu1 }
 0x106   :  { %1114 = vpow2.f32 %v400_v31  ;;  %v381_v39 = vmul.f32 %v892_v32, %v1354_v52  ;;  %v900_v40 = vadd.f32 -1.0, %v1012_v33  ;;  %v891_v41 = vadd.f32 -1.0, %v195_v34 }
 0x107   :  { %1116 = vpow2.f32 %v416_v35  ;;  %v414_v42 = vmul.f32 1.442695, %v386_v37  ;;  %v899_v43 = vadd.f32 -1.0, %v348_v38 }
 0x108   :  { %v1101_v45 = vpop.eup %1100  ;;  %1118 = vpow2.f32 %v398_v36  ;;  %v404_v46 = vmul.f32 1.442695, %v381_v39  ;;  %v389_v47 = vmul.f32 %v900_v40, %v1354_v52  ;;  %v380_v48 = vmul.f32 %v891_v41, %v1354_v52 }
 0x109   :  { %v1103_v49 = vpop.eup %1102  ;;  %1120 = vpow2.f32 %v414_v42  ;;  %v388_v50 = vmul.f32 %v899_v43, %v1354_v52 }
 0x10a   :  { %v1105_v51 = vpop.eup %1104  ;;  %1122 = vpow2.f32 %v404_v46  ;;  %v420_v53 = vmul.f32 1.442695, %v389_v47  ;;  %v402_v54 = vmul.f32 1.442695, %v380_v48  ;;  %v446_v55 = vpack.c.bf16 %v1101_v45, %v1103_v49 }
 0x10b   :  { %v418_v56 = vmul.f32 1.442695, %v388_v50  ;;  %1124 = vpow2.f32 %v408_v44 }
 0x10c   :  { %v1107_v57 = vpop.eup %1106  ;;  %1126 = vpow2.f32 %v420_v53  ;;  %1021 = vmatprep.mubr.msk.bf16.mxu0 %vm454_vm2, %v446_v55 }
 0x10d   :  { %v1109_v58 = vpop.eup %1108  ;;  %1128 = vpow2.f32 %v402_v54 }
 0x10e   :  { %v1111_v59 = vpop.eup %1110  ;;  %1130 = vpow2.f32 %v418_v56 }
 0x10f   :  { %v1113_v60 = vpop.eup %1112  ;;  %v447_v61 = vpack.c.bf16 %v1107_v57, %v1111_v59 }
 0x110   :  { %v1115_v62 = vpop.eup %1114  ;;  %v451_v52 = vpack.c.bf16 %v1109_v58, %v1113_v60 }
 0x111   :  { %v1117_v63 = vpop.eup %1116  ;;  %1022 = vmatmul.mubr.msk.bf16.vlgmr.msra.gmra.mrb[8].mxu0 %vm454_vm2, %v447_v61 }
 0x112   :  { %v1119_v0 = vpop.eup %1118 }
 0x113   :  { %v1121_v1 = vpop.eup %1120  ;;  %v448_v2 = vpack.c.bf16 %v1115_v62, %v1119_v0 }
 0x114   :  { %v1123_v3 = vpop.eup %1122  ;;  %v452_v4 = vpack.c.bf16 %v1117_v63, %v1121_v1 }
 0x115   :  { %v1125_v5 = vpop.eup %1124  ;;  %1025 = vmatprep.mubr.msk.bf16.mxu0 %vm454_vm2, %v448_v2 }
 0x116   :  { %v1127_v6 = vpop.eup %1126  ;;  %v450_v7 = vpack.c.bf16 %v1125_v5, %v1105_v51 }
 0x117   :  { %v1129_v8 = vpop.eup %1128 }
 0x118   :  { %v1131_v9 = vpop.eup %1130  ;;  %1037 = vmatprep.mubr.msk.bf16.mxu1 %vm454_vm2, %v450_v7  ;;  %v449_v10 = vpack.c.bf16 %v1123_v3, %v1129_v8 }
 0x119   :  { %1038 = vmatmul.mubr.msk.bf16.vlgmr.msra.gmra.mrb[8].mxu1 %vm454_vm2, %v451_v52  ;;  %v453_v11 = vpack.c.bf16 %v1127_v6, %v1131_v9 }
 0x11a   :  { %1041 = vmatprep.mubr.msk.bf16.mxu1 %vm454_vm2, %v452_v4  ;;  %1026 = vmatmul.mubr.msk.bf16.gmra.mrb[12].mxu0 %vm454_vm2, %v449_v10 }
 0x121   :  { %1042 = vmatmul.mubr.msk.bf16.gmra.mrb[12].mxu1 %vm454_vm2, %v453_v11 }
 0x1e4   :  { %v1380_v13 = vpop.f32.mrb[8].mxu0 }
 0x1e5   :  { %1132 = vrcp.f32 %v1380_v13  ;;  %v1383_v14 = vpop.f32.mrb[9].mxu0 }
 0x1e6   :  { %v1385_v15 = vpop.f32.mrb[10].mxu0 }
 0x1e7   :  { %v1387_v16 = vpop.f32.mrb[11].mxu0  ;;  %1134 = vrcp.f32 %v1385_v15 }
 0x1ec   :  { %v1390_v17 = vpop.f32.mrb[8].mxu1 }
 0x1ed   :  { %1136 = vrcp.f32 %v1390_v17  ;;  %v1393_v18 = vpop.f32.mrb[9].mxu1  ;;  %v1395_v19 = vpop.f32.mrb[12].mxu0 }
 0x1ee   :  { %v1397_v20 = vpop.f32.mrb[10].mxu1  ;;  %v1399_v21 = vpop.f32.mrb[13].mxu0 }
 0x1ef   :  { %v1133_v22 = vpop.eup %1132  ;;  %1138 = vrcp.f32 %v1397_v20  ;;  %v1402_v23 = vpop.f32.mrb[11].mxu1 }
 0x1f0   :  { %v1404_v24 = vpop.f32.mrb[14].mxu0  ;;  %637 = vperm.xlu1 %1096, %v1133_v22   ;;  %1140 = vrcp.f32 %v1383_v14 }
 0x1f1   :  { %v1406_v25 = vpop.f32.mrb[15].mxu0  ;;  %v1135_v26 = vpop.eup %1134  ;;  %1142 = vrcp.f32 %v1402_v23 }
 0x1f2   :  { %1144 = vrcp.f32 %v1393_v18 }
 0x1f3   :  { %1146 = vrcp.f32 %v1404_v24 }
 0x1f4   :  { %v1410_v27 = vpop.f32.mrb[12].mxu1  ;;  %642 = vperm.xlu1 %1096, %v1135_v26   ;;  %1148 = vrcp.f32 %v1387_v16 }
 0x1f5   :  { %v1413_v28 = vpop.f32.mrb[13].mxu1  ;;  %1150 = vrcp.f32 %v1406_v25 }
 0x1f6   :  { %v1415_v29 = vpop.f32.mrb[14].mxu1  ;;  %1152 = vrcp.f32 %v1395_v19 }
 0x1f7   :  { %v1137_v30 = vpop.eup %1136  ;;  %v1418_v31 = vpop.f32.mrb[15].mxu1 }
 0x1f8   :  { %677 = vperm.xlu0 %1097, %v1137_v30   ;;  %1154 = vrcp.f32 %v1418_v31 }
 0x1f9   :  { %v1139_v32 = vpop.eup %1138  ;;  %1156 = vrcp.f32 %v1410_v27 }
 0x1fa   :  { %682 = vperm.xlu1 %1096, %v1139_v32   ;;  %v1141_v33 = vpop.eup %1140  ;;  %1158 = vrcp.f32 %v1415_v29 }
 0x1fb   :  { %v1143_v34 = vpop.eup %1142  ;;  %1160 = vrcp.f32 %v1399_v21 }
 0x1fc   :  { %627 = vperm.xlu0 %1097, %v1141_v33   ;;  %v1145_v35 = vpop.eup %1144  ;;  %1162 = vrcp.f32 %v1413_v28 }
 0x1fd   :  { %v1147_v36 = vpop.eup %1146 }
 0x1fe   :  { %672 = vperm.xlu1 %1096, %v1143_v34   ;;  %v1149_v37 = vpop.eup %1148 }
 0x1ff   :  { %v1151_v38 = vpop.eup %1150 }
 0x200   :  { %667 = vperm.xlu0 %1097, %v1145_v35   ;;  %v1153_v39 = vpop.eup %1152 }
 0x202   :  { %662 = vperm.xlu1 %1096, %v1147_v36   ;;  %v1155_v40 = vpop.eup %1154 }
 0x203   :  { %v1157_v41 = vpop.eup %1156 }
 0x204   :  { %632 = vperm.xlu0 %1097, %v1149_v37   ;;  %v1159_v42 = vpop.eup %1158 }
 0x205   :  { %v1161_v43 = vpop.eup %1160 }
 0x206   :  { %652 = vperm.xlu1 %1096, %v1151_v38   ;;  %v1163_v44 = vpop.eup %1162 }
 0x208   :  { %657 = vperm.xlu0 %1097, %v1153_v39  }
 0x20a   :  { %692 = vperm.xlu1 %1096, %v1155_v40  }
 0x20c   :  { %697 = vperm.xlu0 %1097, %v1157_v41  }
 0x20e   :  { %702 = vperm.xlu1 %1096, %v1159_v42  }
 0x210   :  { %647 = vperm.xlu0 %1097, %v1161_v43  }
 0x214   :  { %687 = vperm.xlu0 %1097, %v1163_v44  }
 0x26f   :  { %v638_v45 = vpop.permute.xlu1 %637 }
 0x270   :  { %v1429_v46 = vmul.f32 %v1380_v13, %v638_v45 }
 0x272   :  { %v723_v47 = vmul.f32 %v1429_v46, %v1429_v46 }
 0x273   :  { %v643_v48 = vpop.permute.xlu1 %642 }
 0x274   :  { %v743_v49 = vsel %vm50_vm0, %v723_v47, 0.0  ;;  %v1443_v57 = vmul.f32 %v1385_v15, %v643_v48 }
 0x275   :  { %744 = vadd.xlane.f32.xlu0 %v743_v49 }
 0x276   :  { %v724_v0 = vmul.f32 %v1443_v57, %v1443_v57 }
 0x277   :  { %v678_v50 = vpop.permute.xlu0 %677 }
 0x278   :  { %v1435_v51 = vmul.f32 %v1390_v17, %v678_v50  ;;  %v746_v7 = vsel %vm50_vm0, %v724_v0, 0.0 }
 0x279   :  { %v683_v53 = vpop.permute.xlu1 %682 }
 0x27a   :  { %v731_v54 = vmul.f32 %v1435_v51, %v1435_v51  ;;  %v1449_v62 = vmul.f32 %v1397_v20, %v683_v53 }
 0x27b   :  { %v628_v55 = vpop.permute.xlu0 %627 }
 0x27c   :  { %v1440_v56 = vmul.f32 %v628_v55, %v1383_v14  ;;  %v767_v58 = vsel %vm50_vm0, %v731_v54, 0.0  ;;  %v732_v4 = vmul.f32 %v1449_v62, %v1449_v62 }
 0x27d   :  { %768 = vadd.xlane.f32.xlu1 %v767_v58  ;;  %v673_v59 = vpop.permute.xlu1 %672 }
 0x27e   :  { %v721_v60 = vmul.f32 %v1440_v56, %v1440_v56  ;;  %v1462_v5 = vmul.f32 %v673_v59, %v1402_v23  ;;  %v770_v12 = vsel %vm50_vm0, %v732_v4, 0.0 }
 0x27f   :  { %v668_v61 = vpop.permute.xlu0 %667 }
 0x280   :  { %v1452_v52 = vmul.f32 %v668_v61, %v1393_v18  ;;  %v737_v63 = vsel %vm50_vm0, %v721_v60, 0.0 }
 0x281   :  { %738 = vadd.xlane.f32.xlu0 %v737_v63  ;;  %v663_v1 = vpop.permute.xlu1 %662 }
 0x282   :  { %v729_v2 = vmul.f32 %v1452_v52, %v1452_v52  ;;  %v1476_v14 = vmul.f32 %v1404_v24, %v663_v1 }
 0x283   :  { %v633_v3 = vpop.permute.xlu0 %632 }
 0x284   :  { %v1465_v6 = vmul.f32 %v633_v3, %v1387_v16  ;;  %v761_v8 = vsel %vm50_vm0, %v729_v2, 0.0  ;;  %v730_v16 = vmul.f32 %v1462_v5, %v1462_v5  ;;  %v728_v24 = vmul.f32 %v1476_v14, %v1476_v14 }
 0x285   :  { %747 = vadd.xlane.f32.xlu0 %v746_v7  ;;  %762 = vadd.xlane.f32.xlu1 %v761_v8  ;;  %v653_v9 = vpop.permute.xlu1 %652 }
 0x286   :  { %v722_v10 = vmul.f32 %v1465_v6, %v1465_v6  ;;  %v1484_v20 = vmul.f32 %v653_v9, %v1406_v25  ;;  %v758_v33 = vsel %vm50_vm0, %v728_v24, 0.0 }
 0x287   :  { %v658_v11 = vpop.permute.xlu0 %657 }
 0x288   :  { %v1473_v13 = vmul.f32 %v1395_v19, %v658_v11  ;;  %v740_v15 = vsel %vm50_vm0, %v722_v10, 0.0  ;;  %v764_v19 = vsel %vm50_vm0, %v730_v16, 0.0  ;;  %v726_v30 = vmul.f32 %v1484_v20, %v1484_v20 }
 0x289   :  { %771 = vadd.xlane.f32.xlu0 %v770_v12  ;;  %741 = vadd.xlane.f32.xlu1 %v740_v15  ;;  %v693_v22 = vpop.permute.xlu1 %692 }
 0x28a   :  { %v727_v17 = vmul.f32 %v1473_v13, %v1473_v13  ;;  %v1496_v25 = vmul.f32 %v693_v22, %v1418_v31  ;;  %v752_v38 = vsel %vm50_vm0, %v726_v30, 0.0 }
 0x28b   :  { %v698_v18 = vpop.permute.xlu0 %697 }
 0x28c   :  { %v755_v23 = vsel %vm50_vm0, %v727_v17, 0.0  ;;  %v1502_v36 = vmul.f32 %v1410_v27, %v698_v18  ;;  %v734_v40 = vmul.f32 %v1496_v25, %v1496_v25 }
 0x28d   :  { %765 = vadd.xlane.f32.xlu0 %v764_v19  ;;  %756 = vadd.xlane.f32.xlu1 %v755_v23  ;;  %v703_v34 = vpop.permute.xlu1 %702 }
 0x28e   :  { %v776_v42 = vsel %vm50_vm0, %v734_v40, 0.0 }
 0x28f   :  { %v648_v26 = vpop.permute.xlu0 %647 }
 0x290   :  { %v1493_v32 = vmul.f32 %v648_v26, %v1399_v21  ;;  %v1509_v21 = vmul.f32 %v1415_v29, %v703_v34 }
 0x291   :  { %759 = vadd.xlane.f32.xlu0 %v758_v33 }
 0x292   :  { %v725_v35 = vmul.f32 %v1493_v32, %v1493_v32  ;;  %v736_v29 = vmul.f32 %v1509_v21, %v1509_v21 }
 0x293   :  { %v688_v37 = vpop.permute.xlu0 %687 }
 0x294   :  { %v1506_v39 = vmul.f32 %v688_v37, %v1413_v28  ;;  %v749_v31 = vsel %vm50_vm0, %v725_v35, 0.0  ;;  %v735_v28 = vmul.f32 %v1502_v36, %v1502_v36  ;;  %v782_v44 = vsel %vm50_vm0, %v736_v29, 0.0 }
 0x295   :  { %750 = vadd.xlane.f32.xlu1 %v749_v31  ;;  %753 = vadd.xlane.f32.xlu0 %v752_v38 }
 0x296   :  { %v733_v27 = vmul.f32 %v1506_v39, %v1506_v39  ;;  %v779_v43 = vsel %vm50_vm0, %v735_v28, 0.0 }
 0x298   :  { %v773_v41 = vsel %vm50_vm0, %v733_v27, 0.0 }
 0x299   :  { %774 = vadd.xlane.f32.xlu1 %v773_v41  ;;  %777 = vadd.xlane.f32.xlu0 %v776_v42 }
 0x29d   :  { %780 = vadd.xlane.f32.xlu1 %v779_v43  ;;  %783 = vadd.xlane.f32.xlu0 %v782_v44 }
 0x302   :  { %v745_v45 = vpop.xlane.xlu0 %744 }
 0x303   :  { %v787_v47 = vmax.f32 %v745_v45, 1e-24 }
 0x305   :  { %1164 = vrsqrt.f32 %v787_v47 }
 0x30a   :  { %v769_v48 = vpop.xlane.xlu1 %768 }
 0x30b   :  { %v795_v49 = vmax.f32 %v769_v48, 1e-24 }
 0x30d   :  { %1166 = vrsqrt.f32 %v795_v49 }
 0x30e   :  { %v739_v50 = vpop.xlane.xlu0 %738 }
 0x30f   :  { %v1165_v53 = vpop.eup %1164  ;;  %v785_v54 = vmax.f32 %v739_v50, 1e-24 }
 0x310   :  { %v819_v55 = vmul.f32 %v1165_v53, %v1429_v46 }
 0x311   :  { %1168 = vrsqrt.f32 %v785_v54 }
 0x312   :  { %835 = vst.msk [vmem:[%s1606_s2 + $0x10] sm:$0xff] %vm50_vm0, %v819_v55  ;;  %v748_v58 = vpop.xlane.xlu0 %747  ;;  %v763_v59 = vpop.xlane.xlu1 %762 }
 0x313   :  { %v788_v60 = vmax.f32 %v748_v58, 1e-24  ;;  %v793_v61 = vmax.f32 %v763_v59, 1e-24 }
 0x315   :  { %1170 = vrsqrt.f32 %v788_v60 }
 0x316   :  { %1172 = vrsqrt.f32 %v793_v61  ;;  %v772_v63 = vpop.xlane.xlu0 %771  ;;  %v742_v0 = vpop.xlane.xlu1 %741 }
 0x317   :  { %v1167_v1 = vpop.eup %1166  ;;  %v796_v2 = vmax.f32 %v772_v63, 1e-24  ;;  %v786_v3 = vmax.f32 %v742_v0, 1e-24 }
 0x318   :  { %v827_v4 = vmul.f32 %v1167_v1, %v1435_v51 }
 0x319   :  { %1174 = vrsqrt.f32 %v796_v2 }
 0x31a   :  { %843 = vst.msk [vmem:[%s1606_s2 + $0x50] sm:$0xff] %vm50_vm0, %v827_v4  ;;  %1176 = vrsqrt.f32 %v786_v3  ;;  %v766_v46 = vpop.xlane.xlu0 %765  ;;  %v757_v7 = vpop.xlane.xlu1 %756 }
 0x31b   :  { %v1169_v8 = vpop.eup %1168  ;;  %v794_v9 = vmax.f32 %v766_v46, 1e-24  ;;  %v791_v10 = vmax.f32 %v757_v7, 1e-24 }
 0x31c   :  { %v817_v11 = vmul.f32 %v1169_v8, %v1440_v56 }
 0x31d   :  { %1178 = vrsqrt.f32 %v794_v9 }
 0x31e   :  { %833 = vst.msk [vmem:[%s1606_s2] sm:$0xff] %vm50_vm0, %v817_v11  ;;  %1180 = vrsqrt.f32 %v791_v10  ;;  %v760_v51 = vpop.xlane.xlu0 %759 }
 0x31f   :  { %v1171_v12 = vpop.eup %1170  ;;  %v792_v15 = vmax.f32 %v760_v51, 1e-24 }
 0x320   :  { %v1173_v16 = vpop.eup %1172  ;;  %v820_v17 = vmul.f32 %v1171_v12, %v1443_v57 }
 0x321   :  { %v825_v18 = vmul.f32 %v1173_v16, %v1452_v52  ;;  %1182 = vrsqrt.f32 %v792_v15 }
 0x322   :  { %836 = vst.msk [vmem:[%s1606_s2 + $0x18] sm:$0xff] %vm50_vm0, %v820_v17  ;;  %v754_v56 = vpop.xlane.xlu0 %753  ;;  %v751_v22 = vpop.xlane.xlu1 %750 }
 0x323   :  { %v1175_v19 = vpop.eup %1174  ;;  %841 = vst.msk [vmem:[%s1606_s2 + $0x40] sm:$0xff] %vm50_vm0, %v825_v18  ;;  %v790_v23 = vmax.f32 %v754_v56, 1e-24  ;;  %v789_v24 = vmax.f32 %v751_v22, 1e-24 }
 0x324   :  { %v1177_v26 = vpop.eup %1176  ;;  %v828_v57 = vmul.f32 %v1175_v19, %v1449_v62 }
 0x325   :  { %v818_v52 = vmul.f32 %v1177_v26, %v1465_v6  ;;  %1184 = vrsqrt.f32 %v790_v23 }
 0x326   :  { %844 = vst.msk [vmem:[%s1606_s2 + $0x58] sm:$0xff] %vm50_vm0, %v828_v57  ;;  %1186 = vrsqrt.f32 %v789_v24  ;;  %v778_v30 = vpop.xlane.xlu0 %777  ;;  %v775_v33 = vpop.xlane.xlu1 %774 }
 0x327   :  { %v1179_v34 = vpop.eup %1178  ;;  %834 = vst.msk [vmem:[%s1606_s2 + $0x8] sm:$0xff] %vm50_vm0, %v818_v52  ;;  %v798_v35 = vmax.f32 %v778_v30, 1e-24  ;;  %v797_v37 = vmax.f32 %v775_v33, 1e-24 }
 0x328   :  { %v1181_v62 = vpop.eup %1180  ;;  %v826_v6 = vmul.f32 %v1179_v34, %v1462_v5 }
 0x329   :  { %v823_v38 = vmul.f32 %v1181_v62, %v1473_v13  ;;  %1188 = vrsqrt.f32 %v798_v35 }
 0x32a   :  { %842 = vst.msk [vmem:[%s1606_s2 + $0x48] sm:$0xff] %vm50_vm0, %v826_v6  ;;  %1190 = vrsqrt.f32 %v797_v37  ;;  %v784_v31 = vpop.xlane.xlu0 %783  ;;  %v781_v40 = vpop.xlane.xlu1 %780 }
 0x32b   :  { %v1183_v27 = vpop.eup %1182  ;;  %839 = vst.msk [vmem:[%s1606_s2 + $0x30] sm:$0xff] %vm50_vm0, %v823_v38  ;;  %v800_v41 = vmax.f32 %v784_v31, 1e-24  ;;  %v799_v42 = vmax.f32 %v781_v40, 1e-24 }
 0x32c   :  { %v824_v5 = vmul.f32 %v1183_v27, %v1476_v14 }
 0x32d   :  { %1192 = vrsqrt.f32 %v800_v41 }
 0x32e   :  { %840 = vst.msk [vmem:[%s1606_s2 + $0x38] sm:$0xff] %vm50_vm0, %v824_v5  ;;  %1194 = vrsqrt.f32 %v799_v42 }
 0x32f   :  { %v1185_v13 = vpop.eup %1184 }
 0x330   :  { %v1187_v28 = vpop.eup %1186  ;;  %v822_v29 = vmul.f32 %v1185_v13, %v1484_v20 }
 0x331   :  { %v821_v43 = vmul.f32 %v1187_v28, %v1493_v32 }
 0x332   :  { %838 = vst.msk [vmem:[%s1606_s2 + $0x28] sm:$0xff] %vm50_vm0, %v822_v29 }
 0x333   :  { %v1189_v44 = vpop.eup %1188  ;;  %837 = vst.msk [vmem:[%s1606_s2 + $0x20] sm:$0xff] %vm50_vm0, %v821_v43 }
 0x334   :  { %v1191_v14 = vpop.eup %1190  ;;  %v830_v45 = vmul.f32 %v1189_v44, %v1496_v25 }
 0x335   :  { %v829_v47 = vmul.f32 %v1191_v14, %v1506_v39 }
 0x336   :  { %846 = vst.msk [vmem:[%s1606_s2 + $0x68] sm:$0xff] %vm50_vm0, %v830_v45 }
 0x337   :  { %v1193_v20 = vpop.eup %1192  ;;  %845 = vst.msk [vmem:[%s1606_s2 + $0x60] sm:$0xff] %vm50_vm0, %v829_v47 }
 0x338   :  { %v1195_v32 = vpop.eup %1194  ;;  %v832_v48 = vmul.f32 %v1193_v20, %v1509_v21 }
 0x339   :  { %v831_v49 = vmul.f32 %v1195_v32, %v1502_v36 }
 0x33a   :  { %848 = vst.msk [vmem:[%s1606_s2 + $0x78] sm:$0xff] %vm50_vm0, %v832_v48 }
 0x33b   :  { %847 = vst.msk [vmem:[%s1606_s2 + $0x70] sm:$0xff] %vm50_vm0, %v831_v49 }

</bundles_post_ra>
